<compile_context>
chip_gen: v6e
topology: v6e:2x2x1
jax: 0.10.0
libtpu: 0.0.40
codegen_flags: <defaults>
</compile_context>

<pallas_src>
import functools

import numpy as np
import jax
import jax.numpy as jnp
from jax.experimental import pallas as pl
from jax.experimental.pallas import tpu as pltpu

KSIZE = 7
PAD = KSIZE // 2
KW_PAD = 8                       # kw padded 7 -> 8: kh-groups are sublane-aligned
NTAP_PAD = KSIZE * KW_PAD        # 56 rows in the tap-major weight matrix


def _round_up(x, m):
    return -(-x // m) * m


def _vmem_limit_bytes():
    """Generation-aware scoped-VMEM limit (v7x: ~48 MiB, v5e/v6e: 100 MiB)."""
    try:
        cap = int(pltpu.get_tpu_info().vmem_capacity_bytes)
    except Exception:
        cap = 128 * 1024 * 1024
    return min(max(cap - 16 * 1024 * 1024, 32 * 1024 * 1024), 100 * 1024 * 1024)


def _sse_kernel(x_ref, w_ref, col_ref, o_ref, p_pad_ref, r_pad_ref, *, width):
    """SSE for one batch element, flat spatial layout.

    x_ref    : (1, C, HW)              input block (NCHW with H*W flattened)
    w_ref    : (56, C)                 conv weight, kh-major, kw padded to 8
    col_ref  : (1, HW)                 column index of each flat position (f32)
    o_ref    : (1, C, HW)              output block
    p_pad_ref: (56, OFF + HW + OFF)    per-tap channel-reduced maps, row halo
    r_pad_ref: (8,  128 + HW + 128)    row-gathered maps, column halo
    """
    _, _, HW = x_ref.shape
    OFF = _round_up(3 * width, 128)    # >= 3 image rows, lane-aligned
    ROFF = 128                         # >= 3 columns, lane-aligned

    # Halo strips only (interior is fully overwritten below).  Done every step:
    # scratch is per-core, so @pl.when(program_id==0) would skip init on the
    # second TensorCore of a megacore chip.
    p_pad_ref[:, :OFF] = jnp.zeros((NTAP_PAD, OFF), jnp.float32)
    p_pad_ref[:, OFF + HW:] = jnp.zeros((NTAP_PAD, OFF), jnp.float32)
    r_pad_ref[:, :ROFF] = jnp.zeros((KW_PAD, ROFF), jnp.float32)
    r_pad_ref[:, ROFF + HW:] = jnp.zeros((KW_PAD, ROFF), jnp.float32)

    # Channel reduction for all 56 (49 real) taps at once on the MXU, in the
    # native input dtype (bf16 stays bf16), f32 accumulation:
    #   P[k, m] = sum_c w[k, c] * x[c, m]
    p = jnp.dot(w_ref[...], x_ref[0], preferred_element_type=jnp.float32)
    p_pad_ref[:, OFF:OFF + HW] = p                       # (56, HW) f32

    # --- step A: row (kh) gather --------------------------------------------
    # R[kw, m] = sum_kh P[kh*8 + kw, m + (kh-3)*W]; out-of-image rows read the
    # zero halo.  Each term is a sublane-aligned (8, HW) block -> packed vregs.
    def row_slice(kh):
        s = OFF + (kh - PAD) * width
        return p_pad_ref[kh * KW_PAD:(kh + 1) * KW_PAD, s:s + HW]

    r0 = row_slice(0) + row_slice(1)
    r1 = row_slice(2) + row_slice(3)
    r0 = r0 + row_slice(4)
    r1 = r1 + row_slice(5)
    r = (r0 + r1) + row_slice(6)                         # (8, HW); row 7 == 0
    r_pad_ref[:, ROFF:ROFF + HW] = r

    # --- step B: column (kw) gather with border select ----------------------
    # gate[m] = sum_kw R[kw, m + (kw-3)], zeroed where the shifted column falls
    # outside the image row (emulates the conv's zero padding).
    col = col_ref[...]                                   # (1, HW) f32

    def col_term(kw):
        dw = kw - PAD
        shifted = r_pad_ref[kw:kw + 1, ROFF + dw:ROFF + dw + HW]
        valid = (col >= float(-dw)) & (col <= float(width - 1 - dw))
        return jnp.where(valid, shifted, 0.0)

    a0 = col_term(0) + col_term(1)
    a1 = col_term(2) + col_term(3)
    a0 = a0 + col_term(4)
    a1 = a1 + col_term(5)
    acc = (a0 + a1) + col_term(6)                        # (1, HW) f32

    gate = jax.nn.sigmoid(acc)                           # exp on the EUP
    g = gate.astype(o_ref.dtype)[:, None, :]             # bf16 VPU path if bf16
    o_ref[...] = (x_ref[...] * g).astype(o_ref.dtype)


@jax.jit
def sse_layer(x, w):
    """x: (N, C, H, W); w: (C, 7, 7) (out_channels==1 squeezed) -> (N, C, H, W)."""
    N, C, H, W = x.shape
    HW = H * W
    OFF = _round_up(3 * W, 128)
    ROFF = 128

    # Tap-major weight matrix (kh-major, kw padded 7->8 with zero rows):
    #   wmat[kh*8 + kw, c] = w[c, kh, kw]
    wt = jnp.transpose(w, (1, 2, 0))                             # (7, 7, C)
    wt = jnp.pad(wt, ((0, 0), (0, KW_PAD - KSIZE), (0, 0)))      # (7, 8, C)
    wmat = wt.reshape(NTAP_PAD, C).astype(x.dtype)               # (56, C)

    # Column index of every flat spatial position (tiny constant input).
    colidx = jnp.asarray(np.tile(np.arange(W, dtype=np.float32), H))[None, :]

    x_flat = x.reshape(N, C, HW)                                 # free reshape

    kernel = functools.partial(_sse_kernel, width=W)
    out_flat = pl.pallas_call(
        kernel,
        out_shape=jax.ShapeDtypeStruct((N, C, HW), x.dtype),
        grid=(N,),
        in_specs=[
            pl.BlockSpec((1, C, HW), lambda b: (b, 0, 0)),
            pl.BlockSpec((NTAP_PAD, C), lambda b: (0, 0)),
            pl.BlockSpec((1, HW), lambda b: (0, 0)),
        ],
        out_specs=pl.BlockSpec((1, C, HW), lambda b: (b, 0, 0)),
        scratch_shapes=[
            pltpu.VMEM((NTAP_PAD, 2 * OFF + HW), jnp.float32),
            pltpu.VMEM((KW_PAD, 2 * ROFF + HW), jnp.float32),
        ],
        compiler_params=pltpu.CompilerParams(
            dimension_semantics=("parallel",),
            vmem_limit_bytes=_vmem_limit_bytes(),
        ),
    )(x_flat, wmat, colidx)
    return out_flat.reshape(N, C, H, W)


def _reference(x, w):
    """Pure-JAX reference: conv2d(C->1, k=7, pad=3) -> sigmoid -> x * y."""
    y = jax.lax.conv_general_dilated(
        x, w[None, :, :, :],                  # (1, C, 7, 7) OIHW
        window_strides=(1, 1),
        padding=((PAD, PAD), (PAD, PAD)),
        dimension_numbers=("NCHW", "OIHW", "NCHW"),
    )
    return x * jax.nn.sigmoid(y)


if __name__ == "__main__":
    key = jax.random.PRNGKey(0)
    kx, kw = jax.random.split(key)

    N, C, H, W = 2, 4, 16, 16
    x = jax.random.normal(kx, (N, C, H, W), dtype=jnp.float32)
    # Deterministic synthetic conv weight (out_channels=1 squeezed): (C, 7, 7)
    w = jax.random.normal(kw, (C, KSIZE, KSIZE), dtype=jnp.float32) * 0.1

    out = jax.block_until_ready(sse_layer(x, w))
    ref = jax.block_until_ready(_reference(x, w))

    assert out.shape == (N, C, H, W)
    # Slightly looser than exact-f32: MXU / tap summation order differs from
    # XLA's fused conv.
    assert jnp.allclose(out, ref, atol=1e-4, rtol=1e-4), "mismatch vs reference"

    print("KERNEL_OK")
</pallas_src>

<mosaic_0001>
module attributes {stable_mosaic.version = 11 : i64} {
  func.func @_sse_kernel(%arg0: i32, %arg1: memref<1x4x256xf32, #tpu.memory_space<vmem>>, %arg2: memref<56x4xf32, #tpu.memory_space<vmem>>, %arg3: memref<1x256xf32, #tpu.memory_space<vmem>>, %arg4: memref<1x4x256xf32, #tpu.memory_space<vmem>>, %arg5: memref<56x512xf32, #tpu.memory_space<vmem>>, %arg6: memref<8x512xf32, #tpu.memory_space<vmem>>) attributes {dimension_semantics = [#tpu.dimension_semantics<parallel>], iteration_bounds = array<i64: 2>, scalar_prefetch = 0 : i64, scratch_operands = 2 : i64, tpu.core_type = #tpu.core_type<tc>, window_params = [{transform_indices = @transform_0, window_bounds = array<i64: 1, 4, 256>}, {pipeline_mode = #tpu.pipeline_mode<synchronous>, transform_indices = @transform_1, window_bounds = array<i64: 56, 4>}, {pipeline_mode = #tpu.pipeline_mode<synchronous>, transform_indices = @transform_2, window_bounds = array<i64: 1, 256>}, {transform_indices = @transform_3, window_bounds = array<i64: 1, 4, 256>}]} {
    %cst = arith.constant 0.000000e+00 : f32
    %0 = vector.broadcast %cst : f32 to vector<56x128xf32>
    %c0 = arith.constant 0 : index
    %c0_0 = arith.constant 0 : index
    %1 = vector.load %arg5[%c0, %c0_0] : memref<56x512xf32, #tpu.memory_space<vmem>>, vector<56x128xf32>
    tpu.vector_store %arg5[%c0, %c0_0], %0 {strides = array<i32>} : memref<56x512xf32, #tpu.memory_space<vmem>>, vector<56x128xf32>,
    %cst_1 = arith.constant 0.000000e+00 : f32
    %2 = vector.broadcast %cst_1 : f32 to vector<56x128xf32>
    %c0_2 = arith.constant 0 : index
    %c384 = arith.constant 384 : index
    %3 = vector.load %arg5[%c0_2, %c384] : memref<56x512xf32, #tpu.memory_space<vmem>>, vector<56x128xf32>
    tpu.vector_store %arg5[%c0_2, %c384], %2 {strides = array<i32>} : memref<56x512xf32, #tpu.memory_space<vmem>>, vector<56x128xf32>,
    %cst_3 = arith.constant 0.000000e+00 : f32
    %4 = vector.broadcast %cst_3 : f32 to vector<8x128xf32>
    %c0_4 = arith.constant 0 : index
    %c0_5 = arith.constant 0 : index
    %5 = vector.load %arg6[%c0_4, %c0_5] : memref<8x512xf32, #tpu.memory_space<vmem>>, vector<8x128xf32>
    tpu.vector_store %arg6[%c0_4, %c0_5], %4 {strides = array<i32>} : memref<8x512xf32, #tpu.memory_space<vmem>>, vector<8x128xf32>,
    %cst_6 = arith.constant 0.000000e+00 : f32
    %6 = vector.broadcast %cst_6 : f32 to vector<8x128xf32>
    %c0_7 = arith.constant 0 : index
    %c384_8 = arith.constant 384 : index
    %7 = vector.load %arg6[%c0_7, %c384_8] : memref<8x512xf32, #tpu.memory_space<vmem>>, vector<8x128xf32>
    tpu.vector_store %arg6[%c0_7, %c384_8], %6 {strides = array<i32>} : memref<8x512xf32, #tpu.memory_space<vmem>>, vector<8x128xf32>,
    %c0_9 = arith.constant 0 : index
    %c0_10 = arith.constant 0 : index
    %8 = vector.load %arg2[%c0_9, %c0_10] : memref<56x4xf32, #tpu.memory_space<vmem>>, vector<56x4xf32>
    %c0_11 = arith.constant 0 : index
    %c0_12 = arith.constant 0 : index
    %c0_13 = arith.constant 0 : index
    %9 = vector.load %arg1[%c0_11, %c0_12, %c0_13] : memref<1x4x256xf32, #tpu.memory_space<vmem>>, vector<1x4x256xf32>
    %10 = vector.shape_cast %9 : vector<1x4x256xf32> to vector<4x256xf32>
    %cst_14 = arith.constant dense<0.000000e+00> : vector<56x256xf32>
    %11 = tpu.matmul %8, %10, %cst_14 {dimension_numbers = #tpu.dot_dimension_numbers<[1], [0], [0], [1], [0, 0, 1, 1], [], []>} : vector<56x4xf32>, vector<4x256xf32>, vector<56x256xf32> -> vector<56x256xf32>
    %c0_15 = arith.constant 0 : index
    %c128 = arith.constant 128 : index
    %12 = vector.load %arg5[%c0_15, %c128] : memref<56x512xf32, #tpu.memory_space<vmem>>, vector<56x256xf32>
    tpu.vector_store %arg5[%c0_15, %c128], %11 {strides = array<i32>} : memref<56x512xf32, #tpu.memory_space<vmem>>, vector<56x256xf32>,
    %c0_16 = arith.constant 0 : index
    %c80 = arith.constant 80 : index
    %13 = vector.load %arg5[%c0_16, %c80] : memref<56x512xf32, #tpu.memory_space<vmem>>, vector<8x256xf32>
    %c8 = arith.constant 8 : index
    %c96 = arith.constant 96 : index
    %14 = vector.load %arg5[%c8, %c96] : memref<56x512xf32, #tpu.memory_space<vmem>>, vector<8x256xf32>
    %15 = arith.addf %13, %14 : vector<8x256xf32>
    %c16 = arith.constant 16 : index
    %c112 = arith.constant 112 : index
    %16 = vector.load %arg5[%c16, %c112] : memref<56x512xf32, #tpu.memory_space<vmem>>, vector<8x256xf32>
    %c24 = arith.constant 24 : index
    %c128_17 = arith.constant 128 : index
    %17 = vector.load %arg5[%c24, %c128_17] : memref<56x512xf32, #tpu.memory_space<vmem>>, vector<8x256xf32>
    %18 = arith.addf %16, %17 : vector<8x256xf32>
    %c32 = arith.constant 32 : index
    %c144 = arith.constant 144 : index
    %19 = vector.load %arg5[%c32, %c144] : memref<56x512xf32, #tpu.memory_space<vmem>>, vector<8x256xf32>
    %20 = arith.addf %15, %19 : vector<8x256xf32>
    %c40 = arith.constant 40 : index
    %c160 = arith.constant 160 : index
    %21 = vector.load %arg5[%c40, %c160] : memref<56x512xf32, #tpu.memory_space<vmem>>, vector<8x256xf32>
    %22 = arith.addf %18, %21 : vector<8x256xf32>
    %23 = arith.addf %20, %22 : vector<8x256xf32>
    %c48 = arith.constant 48 : index
    %c176 = arith.constant 176 : index
    %24 = vector.load %arg5[%c48, %c176] : memref<56x512xf32, #tpu.memory_space<vmem>>, vector<8x256xf32>
    %25 = arith.addf %23, %24 : vector<8x256xf32>
    %c0_18 = arith.constant 0 : index
    %c128_19 = arith.constant 128 : index
    %26 = vector.load %arg6[%c0_18, %c128_19] : memref<8x512xf32, #tpu.memory_space<vmem>>, vector<8x256xf32>
    tpu.vector_store %arg6[%c0_18, %c128_19], %25 {strides = array<i32>} : memref<8x512xf32, #tpu.memory_space<vmem>>, vector<8x256xf32>,
    %c0_20 = arith.constant 0 : index
    %c0_21 = arith.constant 0 : index
    %27 = vector.load %arg3[%c0_20, %c0_21] : memref<1x256xf32, #tpu.memory_space<vmem>>, vector<1x256xf32>
    %c0_22 = arith.constant 0 : index
    %c125 = arith.constant 125 : index
    %28 = vector.load %arg6[%c0_22, %c125] : memref<8x512xf32, #tpu.memory_space<vmem>>, vector<1x256xf32>
    %cst_23 = arith.constant 3.000000e+00 : f32
    %29 = vector.broadcast %cst_23 : f32 to vector<1x256xf32>
    %30 = arith.cmpf oge, %27, %29 : vector<1x256xf32>
    %cst_24 = arith.constant 1.800000e+01 : f32
    %31 = vector.broadcast %cst_24 : f32 to vector<1x256xf32>
    %32 = arith.cmpf ole, %27, %31 : vector<1x256xf32>
    %33 = arith.andi %30, %32 : vector<1x256xi1>
    %cst_25 = arith.constant 0.000000e+00 : f32
    %34 = vector.broadcast %cst_25 : f32 to vector<1x256xf32>
    %35 = arith.select %33, %28, %34 : vector<1x256xi1>, vector<1x256xf32>
    %c1 = arith.constant 1 : index
    %c126 = arith.constant 126 : index
    %36 = vector.load %arg6[%c1, %c126] : memref<8x512xf32, #tpu.memory_space<vmem>>, vector<1x256xf32>
    %cst_26 = arith.constant 2.000000e+00 : f32
    %37 = vector.broadcast %cst_26 : f32 to vector<1x256xf32>
    %38 = arith.cmpf oge, %27, %37 : vector<1x256xf32>
    %cst_27 = arith.constant 1.700000e+01 : f32
    %39 = vector.broadcast %cst_27 : f32 to vector<1x256xf32>
    %40 = arith.cmpf ole, %27, %39 : vector<1x256xf32>
    %41 = arith.andi %38, %40 : vector<1x256xi1>
    %cst_28 = arith.constant 0.000000e+00 : f32
    %42 = vector.broadcast %cst_28 : f32 to vector<1x256xf32>
    %43 = arith.select %41, %36, %42 : vector<1x256xi1>, vector<1x256xf32>
    %44 = arith.addf %35, %43 : vector<1x256xf32>
    %c2 = arith.constant 2 : index
    %c127 = arith.constant 127 : index
    %45 = vector.load %arg6[%c2, %c127] : memref<8x512xf32, #tpu.memory_space<vmem>>, vector<1x256xf32>
    %cst_29 = arith.constant 1.000000e+00 : f32
    %46 = vector.broadcast %cst_29 : f32 to vector<1x256xf32>
    %47 = arith.cmpf oge, %27, %46 : vector<1x256xf32>
    %cst_30 = arith.constant 1.600000e+01 : f32
    %48 = vector.broadcast %cst_30 : f32 to vector<1x256xf32>
    %49 = arith.cmpf ole, %27, %48 : vector<1x256xf32>
    %50 = arith.andi %47, %49 : vector<1x256xi1>
    %cst_31 = arith.constant 0.000000e+00 : f32
    %51 = vector.broadcast %cst_31 : f32 to vector<1x256xf32>
    %52 = arith.select %50, %45, %51 : vector<1x256xi1>, vector<1x256xf32>
    %c3 = arith.constant 3 : index
    %c128_32 = arith.constant 128 : index
    %53 = vector.load %arg6[%c3, %c128_32] : memref<8x512xf32, #tpu.memory_space<vmem>>, vector<1x256xf32>
    %cst_33 = arith.constant 0.000000e+00 : f32
    %54 = vector.broadcast %cst_33 : f32 to vector<1x256xf32>
    %55 = arith.cmpf oge, %27, %54 : vector<1x256xf32>
    %cst_34 = arith.constant 1.500000e+01 : f32
    %56 = vector.broadcast %cst_34 : f32 to vector<1x256xf32>
    %57 = arith.cmpf ole, %27, %56 : vector<1x256xf32>
    %58 = arith.andi %55, %57 : vector<1x256xi1>
    %cst_35 = arith.constant 0.000000e+00 : f32
    %59 = vector.broadcast %cst_35 : f32 to vector<1x256xf32>
    %60 = arith.select %58, %53, %59 : vector<1x256xi1>, vector<1x256xf32>
    %61 = arith.addf %52, %60 : vector<1x256xf32>
    %c4 = arith.constant 4 : index
    %c129 = arith.constant 129 : index
    %62 = vector.load %arg6[%c4, %c129] : memref<8x512xf32, #tpu.memory_space<vmem>>, vector<1x256xf32>
    %cst_36 = arith.constant -1.000000e+00 : f32
    %63 = vector.broadcast %cst_36 : f32 to vector<1x256xf32>
    %64 = arith.cmpf oge, %27, %63 : vector<1x256xf32>
    %cst_37 = arith.constant 1.400000e+01 : f32
    %65 = vector.broadcast %cst_37 : f32 to vector<1x256xf32>
    %66 = arith.cmpf ole, %27, %65 : vector<1x256xf32>
    %67 = arith.andi %64, %66 : vector<1x256xi1>
    %cst_38 = arith.constant 0.000000e+00 : f32
    %68 = vector.broadcast %cst_38 : f32 to vector<1x256xf32>
    %69 = arith.select %67, %62, %68 : vector<1x256xi1>, vector<1x256xf32>
    %70 = arith.addf %44, %69 : vector<1x256xf32>
    %c5 = arith.constant 5 : index
    %c130 = arith.constant 130 : index
    %71 = vector.load %arg6[%c5, %c130] : memref<8x512xf32, #tpu.memory_space<vmem>>, vector<1x256xf32>
    %cst_39 = arith.constant -2.000000e+00 : f32
    %72 = vector.broadcast %cst_39 : f32 to vector<1x256xf32>
    %73 = arith.cmpf oge, %27, %72 : vector<1x256xf32>
    %cst_40 = arith.constant 1.300000e+01 : f32
    %74 = vector.broadcast %cst_40 : f32 to vector<1x256xf32>
    %75 = arith.cmpf ole, %27, %74 : vector<1x256xf32>
    %76 = arith.andi %73, %75 : vector<1x256xi1>
    %cst_41 = arith.constant 0.000000e+00 : f32
    %77 = vector.broadcast %cst_41 : f32 to vector<1x256xf32>
    %78 = arith.select %76, %71, %77 : vector<1x256xi1>, vector<1x256xf32>
    %79 = arith.addf %61, %78 : vector<1x256xf32>
    %80 = arith.addf %70, %79 : vector<1x256xf32>
    %c6 = arith.constant 6 : index
    %c131 = arith.constant 131 : index
    %81 = vector.load %arg6[%c6, %c131] : memref<8x512xf32, #tpu.memory_space<vmem>>, vector<1x256xf32>
    %cst_42 = arith.constant -3.000000e+00 : f32
    %82 = vector.broadcast %cst_42 : f32 to vector<1x256xf32>
    %83 = arith.cmpf oge, %27, %82 : vector<1x256xf32>
    %cst_43 = arith.constant 1.200000e+01 : f32
    %84 = vector.broadcast %cst_43 : f32 to vector<1x256xf32>
    %85 = arith.cmpf ole, %27, %84 : vector<1x256xf32>
    %86 = arith.andi %83, %85 : vector<1x256xi1>
    %cst_44 = arith.constant 0.000000e+00 : f32
    %87 = vector.broadcast %cst_44 : f32 to vector<1x256xf32>
    %88 = arith.select %86, %81, %87 : vector<1x256xi1>, vector<1x256xf32>
    %89 = arith.addf %80, %88 : vector<1x256xf32>
    %90 = arith.negf %89 : vector<1x256xf32>
    %91 = math.exp %90 : vector<1x256xf32>
    %cst_45 = arith.constant 1.000000e+00 : f32
    %92 = vector.broadcast %cst_45 : f32 to vector<1x256xf32>
    %93 = arith.addf %92, %91 : vector<1x256xf32>
    %94 = arith.divf %92, %93 : vector<1x256xf32>
    %95 = vector.shape_cast %94 : vector<1x256xf32> to vector<1x1x256xf32>
    %c0_46 = arith.constant 0 : index
    %c0_47 = arith.constant 0 : index
    %c0_48 = arith.constant 0 : index
    %96 = vector.load %arg1[%c0_46, %c0_47, %c0_48] : memref<1x4x256xf32, #tpu.memory_space<vmem>>, vector<1x4x256xf32>
    %97 = vector.broadcast %95 : vector<1x1x256xf32> to vector<1x4x256xf32>
    %98 = arith.mulf %96, %97 : vector<1x4x256xf32>
    %c0_49 = arith.constant 0 : index
    %c0_50 = arith.constant 0 : index
    %c0_51 = arith.constant 0 : index
    %99 = vector.load %arg4[%c0_49, %c0_50, %c0_51] : memref<1x4x256xf32, #tpu.memory_space<vmem>>, vector<1x4x256xf32>
    tpu.vector_store %arg4[%c0_49, %c0_50, %c0_51], %98 {strides = array<i32>} : memref<1x4x256xf32, #tpu.memory_space<vmem>>, vector<1x4x256xf32>,
    return
  }
  func.func @transform_0(%arg0: i32) -> (i32, i32, i32) {
    %c0_i32 = arith.constant 0 : i32
    %c0_i32_0 = arith.constant 0 : i32
    %c0_i32_1 = arith.constant 0 : i32
    return %arg0, %c0_i32, %c0_i32_0 : i32, i32, i32
  }
  func.func @transform_1(%arg0: i32) -> (i32, i32) {
    %c0_i32 = arith.constant 0 : i32
    %c0_i32_0 = arith.constant 0 : i32
    %c0_i32_1 = arith.constant 0 : i32
    return %c0_i32, %c0_i32_0 : i32, i32
  }
  func.func @transform_2(%arg0: i32) -> (i32, i32) {
    %c0_i32 = arith.constant 0 : i32
    %c0_i32_0 = arith.constant 0 : i32
    %c0_i32_1 = arith.constant 0 : i32
    return %c0_i32, %c0_i32_0 : i32, i32
  }
  func.func @transform_3(%arg0: i32) -> (i32, i32, i32) {
    %c0_i32 = arith.constant 0 : i32
    %c0_i32_0 = arith.constant 0 : i32
    %c0_i32_1 = arith.constant 0 : i32
    return %arg0, %c0_i32, %c0_i32_0 : i32, i32, i32
  }
}

</mosaic_0001>

<bundles_post_ra>
// kernel: sse_layer.1
= control target key start
LH: loop header
LB: loop body
LE: loop exit
PB: predicated region body
PF: predicated region fallthrough
CT: control target
= control target key end

     0   :  { %s741_s12 = smov 0   ;;  %s856_s0 = inlined_call_operand.vmem [shape: f32[2,4,256], index: 0, kind: input, shape index: {}]   ;;  %s857_s1 = inlined_call_operand.vmem [shape: f32[56,4], index: 1, kind: input, shape index: {}]   ;;  %s858_s2 = inlined_call_operand.vmem [shape: f32[1,256], index: 2, kind: input, shape index: {}]   ;;  %s859_s3 = inlined_call_operand.vmem [shape: f32[2,4,256], index: 3, kind: output, shape index: {}]  }
   0x1 LB: > { %s649_s13 = sadd.s32 4294967295, %s706_s12   ;;  %p653_p0 = scmp.ge.s32.totalorder %s706_s12, 1  ;;  %s706_s12 = sphi %s741_s12, %s13_s12  }
   0x2   : > { %p137_p1 = scmp.lt.s32.totalorder %s706_s12, 3 }
   0x4   : > { %p138_p2 = pnand %p653_p0, %p137_p1 }
   0x5   : > { %p161_p3 = scmp.lt.s32.totalorder (!%p138_p2), %s649_s13, 1  ;;  %s709_s5 = smov (!%p138_p2), 80  }
   0x6   : > { %141 = sbr.rel (%p138_p2) target bundleno = 768 (0x300), region = 32  ;;  %s710_s6 = smov (!%p138_p2), 112  }
   0x7   : > { %s711_s7 = smov (!%p138_p2), 64   ;;  %s712_s8 = smov (!%p138_p2), 32  }
   0x8   : > { %s713_s9 = smov (!%p138_p2), 96   ;;  %s714_s10 = smov (!%p138_p2), 48  }
   0x9   : > { %s715_s11 = smov (!%p138_p2), 2   ;;  %s716_s15 = smov (!%p138_p2), 3  }
   0xa   : > { %s717_s16 = smov (!%p138_p2), 127   ;;  %s719_s18 = smov (!%p138_p2), 125  }
   0xb   : > { %v708_v0 = vmov 0.0   ;;  %s872_s13 = smov (!%p161_p3, %s649_s13), 1  ;;  %vm219_vm0 = vcmask 1043456   ;;  %v187_v3 = vld [vmem:[%s857_s1] sm:$0xff]  ;;  %vm197_vm1 = vcmask 31744   ;;  %v188_v5 = vld [vmem:[%s857_s1 + $0x8] sm:$0xff] }
   0xc   : > { %288 = vmatprep.mubr.f32.mxu0 %v708_v0  ;;  %185 = vst [vmem:[#allocation3] sm:$0xff] %v708_v0  ;;  %186 = vst [vmem:[#allocation3 + $0x18] sm:$0xff] %v708_v0  ;;  %312 = vmatprep.mubr.f32.mxu1 %v708_v0  ;;  %s670_s14 = sshll.u32 %s872_s13, 3  ;;  %v191_v4 = vld [vmem:[%s857_s1 + $0x20] sm:$0xff]  ;;  %v192_v6 = vld [vmem:[%s857_s1 + $0x28] sm:$0xff]  ;;  %vm360_vm2 = vcmask 916480  }
   0xd   : > { %s165_s17 = scalar_lea.vmem %s856_s0, %s670_s14  ;;  %v189_v7 = vld [vmem:[%s857_s1 + $0x10] sm:$0xff]  ;;  %v190_v9 = vld [vmem:[%s857_s1 + $0x18] sm:$0xff]  ;;  %vm420_vm3 = vcmask 654336   ;;  %vm399_vm4 = vcmask 523264   ;;  %vm438_vm5 = vcmask 785408   ;;  %vm459_vm6 = vcmask 261120   ;;  %s170_s24 = scalar_lea.vmem %s859_s3, %s670_s14 }
   0xe   : > { %v761_v1 = vld [vmem:[%s165_s17] sm:$0xff]  ;;  %v193_v8 = vld [vmem:[%s857_s1 + $0x30] sm:$0xff]  ;;  %vm477_vm7 = vcmask 392192   ;;  %s718_s17 = smov 1   ;;  %s720_s19 = smov 126   ;;  %vm506_vm12 = vcmask 15360  }
   0xf   : > { %v196_v2 = vcombine.high %v761_v1, %v761_v1  ;;  %vm493_vm13 = vcmask 23552  }
  0x11   : > { %658 = vmatprep.subr.msk.mxu0 %vm219_vm0, %v196_v2  ;;  %672 = vmatprep.subr.msk.mxu1 %vm219_vm0, %v196_v2 }
  0x12   : > { %659 = vmatpush1.msk.msra.mxu0 %vm219_vm0, %v761_v1  ;;  %673 = vmatpush1.msk.msra.mxu1 %vm219_vm0, %v761_v1 }
  0x13   : > { %660 = vmatmul.mubr.msk.f32.vlgmr.msra.gmra.mxu0 %vm197_vm1, %v187_v3  ;;  %664 = vmatmul.mubr.msk.f32.vlgmr.msra.gmra.mxu1 %vm197_vm1, %v191_v4 }
  0x14   : > { %294 = vmatprep.mubr.f32.mxu0 %v708_v0  ;;  %318 = vmatprep.mubr.f32.mxu1 %v708_v0 }
  0x17   : > { %661 = vmatmul.mubr.msk.f32.gmra.mxu0 %vm197_vm1, %v188_v5  ;;  %665 = vmatmul.mubr.msk.f32.gmra.mxu1 %vm197_vm1, %v192_v6 }
  0x18   : > { %300 = vmatprep.mubr.f32.mxu0 %v708_v0  ;;  %324 = vmatprep.mubr.f32.mxu1 %v708_v0 }
  0x1b   : > { %662 = vmatmul.mubr.msk.f32.gmra.mxu0 %vm197_vm1, %v189_v7  ;;  %666 = vmatmul.mubr.msk.f32.gmra.mxu1 %vm197_vm1, %v193_v8 }
  0x1c   : > { %306 = vmatprep.mubr.f32.mxu0 %v708_v0 }
  0x1f   : > { %663 = vmatmul.mubr.msk.f32.gmra.mxu0 %vm197_vm1, %v190_v9 }
  0xd3   : > { %v800_v10 = vpop.f32.mrf.mxu0  ;;  %v314_v11 = vpop.f32.mrf.mxu1 }
  0xd5   : > { %v802_v12 = vpop.f32.mrf.mxu0  ;;  %v316_v13 = vpop.f32.mrf.mxu1 }
  0xd7   : > { %v296_v14 = vpop.f32.mrf.mxu0  ;;  %v320_v15 = vpop.f32.mrf.mxu1 }
  0xd8   : > { %414 = vrot.lane.b32.xlu1 %v320_v15, %s709_s5 }
  0xd9   : > { %v298_v16 = vpop.f32.mrf.mxu0  ;;  %v322_v17 = vpop.f32.mrf.mxu1 }
  0xdb   : > { %v302_v18 = vpop.f32.mrf.mxu0  ;;  %v326_v22 = vpop.f32.mrf.mxu1 }
  0xdc   : > { %416 = vrot.lane.b32.xlu1 %v322_v17, %s709_s5 }
  0xdd   : > { %v304_v19 = vpop.f32.mrf.mxu0  ;;  %v328_v36 = vpop.f32.mrf.mxu1 }
  0xdf   : > { %v308_v20 = vpop.f32.mrf.mxu0 }
  0xe0   : > { %356 = vrot.lane.b32.xlu1 %v296_v14, %s710_s6  ;;  %376 = vrot.lane.b32.xlu0 %v308_v20, %s710_s6 }
  0xe1   : > { %v310_v21 = vpop.f32.mrf.mxu0 }
  0xe4   : > { %354 = vrot.lane.b32.xlu1 %v708_v0, %s710_s6  ;;  %378 = vrot.lane.b32.xlu0 %v310_v21, %s710_s6 }
  0xe8   : > { %395 = vrot.lane.b32.xlu1 %v316_v13, %s711_s7  ;;  %418 = vrot.lane.b32.xlu0 %v708_v0, %s709_s5 }
  0xec   : > { %358 = vrot.lane.b32.xlu0 %v298_v16, %s710_s6  ;;  %v484_v16 = vld [vmem:[%s858_s2] sm:$0x3] }
  0xed   : > { %vm499_vm8 = vcmp.ge.f32.partialorder %v484_v16, 2.0  ;;  %vm500_vm9 = vcmp.le.f32.partialorder %v484_v16, 17.0  ;;  %vm486_vm10 = vcmp.ge.f32.partialorder %v484_v16, 3.0  ;;  %vm487_vm11 = vcmp.le.f32.partialorder %v484_v16, 18.0 }
  0xee   : > { %vm513_vm14 = vcmp.ge.f32.partialorder %v484_v16, 1.0  ;;  %vm514_vm15 = vcmp.le.f32.partialorder %v484_v16, 16.0  ;;  %vm816_vm0 = vmand %vm499_vm8, %vm500_vm9  ;;  %vm526_vm1 = vcmp.ge.f32.partialorder %v484_v16, 0.0 }
  0xef   : > { %vm825_vm8 = vmand %vm513_vm14, %vm514_vm15  ;;  %vm562_vm14 = vcmp.ge.f32.partialorder %v484_v16, -3.0 }
  0xf0   : > { %393 = vrot.lane.b32.xlu0 %v314_v11, %s711_s7 }
  0xf4   : > { %397 = vrot.lane.b32.xlu0 %v708_v0, %s711_s7 }
  0xf8   : > { %453 = vrot.lane.b32.xlu0 %v326_v22, %s712_s8  ;;  %v862_v22 = vmov 0 }
 0x14a   : > { %v415_v23 = vpop.permute.xlu1 %414 }
 0x14e   : > { %v417_v28 = vpop.permute.xlu1 %416 }
 0x14f   : > { %v421_v30 = vsel %vm420_vm3, %v415_v23, %v417_v28 }
 0x152   : > { %v377_v24 = vpop.permute.xlu0 %376  ;;  %v357_v38 = vpop.permute.xlu1 %356 }
 0x153   : > { %v426_v25 = vadd.f32 %v415_v23, %v377_v24 }
 0x155   : > { %432 = vrot.lane.b32.xlu1 %v426_v25, %s713_s9 }
 0x156   : > { %v379_v26 = vpop.permute.xlu0 %378  ;;  %v355_v40 = vpop.permute.xlu1 %354 }
 0x157   : > { %v380_v27 = vsel %vm360_vm2, %v377_v24, %v379_v26  ;;  %v386_v31 = vadd.f32 %v379_v26, %v304_v19  ;;  %v361_v45 = vsel %vm360_vm2, %v355_v40, %v357_v38 }
 0x158   : > { %v385_v29 = vadd.f32 %v380_v27, %v302_v18 }
 0x15a   : > { %v419_v32 = vpop.permute.xlu0 %418  ;;  %v427_v33 = vadd.f32 %v421_v30, %v385_v29  ;;  %v396_v42 = vpop.permute.xlu1 %395 }
 0x15b   : > { %v422_v34 = vsel %vm420_vm3, %v417_v28, %v419_v32  ;;  %vm820_vm3 = vmand %vm486_vm10, %vm487_vm11  ;;  %vm547_vm10 = vcmp.ge.f32.partialorder %v484_v16, -2.0  ;;  %vm548_vm11 = vcmp.le.f32.partialorder %v484_v16, 13.0 }
 0x15c   : > { %v428_v35 = vadd.f32 %v422_v34, %v386_v31  ;;  %434 = vrot.lane.b32.xlu0 %v427_v33, %s713_s9  ;;  %v863_v22 = vsel %vm820_vm3, 4294967295, %v862_v22  ;;  %vm549_vm15 = vmand %vm547_vm10, %vm548_vm11 }
 0x15e   : > { %436 = vrot.lane.b32.xlu1 %v428_v35, %s713_s9  ;;  %v359_v37 = vpop.permute.xlu0 %358 }
 0x15f   : > { %v362_v46 = vsel %vm360_vm2, %v357_v38, %v359_v37  ;;  %v368_v53 = vadd.f32 %v359_v37, %v802_v12  ;;  %vm527_vm2 = vcmp.le.f32.partialorder %v484_v16, 15.0 }
 0x160   : > { %457 = vrot.lane.b32.xlu0 %v708_v0, %s712_s8  ;;  %v367_v52 = vadd.f32 %v362_v46, %v800_v10  ;;  %vm829_vm9 = vmand %vm526_vm1, %vm527_vm2  ;;  %vm569_vm1 = vcmask 1022976  }
 0x162   : > { %455 = vrot.lane.b32.xlu1 %v328_v36, %s712_s8  ;;  %v394_v39 = vpop.permute.xlu0 %393 }
 0x163   : > { %v405_v47 = vadd.f32 %v394_v39, %v361_v45  ;;  %v400_v49 = vsel %vm399_vm4, %v394_v39, %v396_v42 }
 0x164   : > { %v406_v57 = vadd.f32 %v400_v49, %v367_v52 }
 0x166   : > { %v398_v41 = vpop.permute.xlu0 %397 }
 0x167   : > { %v401_v50 = vsel %vm399_vm4, %v396_v42, %v398_v41  ;;  %vm533_vm4 = vcmp.ge.f32.partialorder %v484_v16, -1.0 }
 0x168   : > { %v407_v58 = vadd.f32 %v401_v50, %v368_v53 }
 0x16a   : > { %v454_v43 = vpop.permute.xlu0 %453 }
 0x1c7   : > { %v433_v44 = vpop.permute.xlu1 %432 }
 0x1ce   : > { %v435_v48 = vpop.permute.xlu0 %434 }
 0x1cf   : > { %v439_v51 = vsel %vm438_vm5, %v433_v44, %v435_v48 }
 0x1d0   : > { %v444_v54 = vadd.f32 %v439_v51, %v405_v47  ;;  %v437_v55 = vpop.permute.xlu1 %436 }
 0x1d1   : > { %v440_v56 = vsel %vm438_vm5, %v435_v48, %v437_v55  ;;  %v446_v62 = vadd.f32 %v437_v55, %v407_v58  ;;  %vm534_vm5 = vcmp.le.f32.partialorder %v484_v16, 14.0 }
 0x1d2   : > { %v465_v59 = vadd.f32 %v454_v43, %v444_v54  ;;  %v458_v60 = vpop.permute.xlu0 %457  ;;  %v445_v61 = vadd.f32 %v440_v56, %v406_v57  ;;  %vm833_vm3 = vmand %vm533_vm4, %vm534_vm5  ;;  %v582_v57 = vlaneseq }
 0x1d4   : > { %v456_v63 = vpop.permute.xlu1 %455  ;;  %471 = vrot.lane.b32.xlu1 %v465_v59, %s714_s10  ;;  %v583_v58 = vshrl.u32 %v582_v57, 7 }
 0x1d5   : > { %v460_v0 = vsel %vm459_vm6, %v454_v43, %v456_v63  ;;  %v461_v2 = vsel %vm459_vm6, %v456_v63, %v458_v60  ;;  %vm540_vm6 = vcmask 1039360  }
 0x1d6   : > { %v466_v3 = vadd.f32 %v460_v0, %v445_v61  ;;  %v467_v4 = vadd.f32 %v461_v2, %v446_v62  ;;  %v584_v59 = vsub.s32 0, %v583_v58  ;;  %v588_v60 = vsub.s32 1, %v583_v58 }
 0x1d8   : > { %473 = vrot.lane.b32.xlu0 %v466_v3, %s714_s10  ;;  %475 = vrot.lane.b32.xlu1 %v467_v4, %s714_s10 }
 0x246   : > { %v472_v5 = vpop.permute.xlu1 %471 }
 0x24a   : > { %v476_v6 = vpop.permute.xlu1 %475  ;;  %v474_v7 = vpop.permute.xlu0 %473 }
 0x24b   : > { %v478_v8 = vsel %vm477_vm7, %v472_v5, %v474_v7  ;;  %v479_v9 = vsel %vm477_vm7, %v474_v7, %v476_v6  ;;  %vm520_vm7 = vcmask 7168  }
 0x24c   : > { %482 = vst [vmem:[#allocation3 + $0x8] sm:$0xff] %v478_v8  ;;  %483 = vst [vmem:[#allocation3 + $0x10] sm:$0xff] %v479_v9 }
 0x253   : > { %v498_v10 = vld [vmem:[#allocation3 + $0x1] ss:$8 sm:$0x7]  ;;  %v485_v11 = vld [vmem:[#allocation3] ss:$8 sm:$0x7] }
 0x254   : > { %503 = vrot.lane.b32.xlu1 %v498_v10, %s715_s11  ;;  %490 = vrot.lane.b32.xlu0 %v485_v11, %s716_s15  ;;  %v532_v12 = vld [vmem:[#allocation3 + $0xc] ss:$8 sm:$0x7]  ;;  %v512_v13 = vld [vmem:[#allocation3 + $0x2] ss:$8 sm:$0x7] }
 0x255   : > { %v561_v14 = vld [vmem:[#allocation3 + $0xe] ss:$8 sm:$0x7]  ;;  %v546_v15 = vld [vmem:[#allocation3 + $0xd] ss:$8 sm:$0x7] }
 0x256   : > { %v525_v33 = vld [vmem:[#allocation3 + $0xb] ss:$8 sm:$0x3] }
 0x257   : > { %v529_v43 = vsel %vm829_vm9, %v525_v33, 0.0 }
 0x258   : > { %537 = vrot.lane.b32.xlu1 %v532_v12, %s717_s16  ;;  %517 = vrot.lane.b32.xlu0 %v512_v13, %s718_s17 }
 0x25c   : > { %566 = vrot.lane.b32.xlu1 %v561_v14, %s719_s18  ;;  %551 = vrot.lane.b32.xlu0 %v546_v15, %s720_s19 }
 0x2c6   : > { %v504_v17 = vpop.permute.xlu1 %503  ;;  %v491_v18 = vpop.permute.xlu0 %490 }
 0x2c7   : > { %v505_v19 = vrot.slane %v504_v17, 1  ;;  %v492_v20 = vrot.slane %v491_v18, 1 }
 0x2c9   : > { %v507_v25 = vsel %vm506_vm12, %v504_v17, %v505_v19  ;;  %v494_v26 = vsel %vm493_vm13, %v491_v18, %v492_v20  ;;  %vm870_vm12 = vnez %v863_v22  ;;  %vm554_vm13 = vcmask 1031168  }
 0x2ca   : > { %v538_v23 = vpop.permute.xlu1 %537  ;;  %v518_v24 = vpop.permute.xlu0 %517  ;;  %v509_v35 = vsel %vm816_vm0, %v507_v25, 0.0  ;;  %v496_v36 = vsel %vm870_vm12, %v494_v26, 0.0  ;;  %vm563_vm0 = vcmp.le.f32.partialorder %v484_v16, 12.0 }
 0x2cb   : > { %v539_v27 = vrot.slane %v538_v23, 1  ;;  %v519_v29 = vrot.slane %v518_v24, 1  ;;  %v510_v44 = vadd.f32 %v509_v35, %v496_v36  ;;  %vm564_vm2 = vmand %vm562_vm14, %vm563_vm0 }
 0x2cd   : > { %v541_v32 = vsel %vm540_vm6, %v538_v23, %v539_v27  ;;  %v521_v34 = vsel %vm520_vm7, %v518_v24, %v519_v29 }
 0x2ce   : > { %v523_v37 = vsel %vm825_vm8, %v521_v34, 0.0  ;;  %v567_v38 = vpop.permute.xlu1 %566  ;;  %v552_v39 = vpop.permute.xlu0 %551  ;;  %v543_v42 = vsel %vm833_vm3, %v541_v32, 0.0 }
 0x2cf   : > { %v568_v40 = vrot.slane %v567_v38, 1  ;;  %v553_v41 = vrot.slane %v552_v39, 1  ;;  %v530_v45 = vadd.f32 %v529_v43, %v523_v37  ;;  %v544_v48 = vadd.f32 %v543_v42, %v510_v44 }
 0x2d1   : > { %v555_v46 = vsel %vm554_vm13, %v552_v39, %v553_v41  ;;  %v570_v49 = vsel %vm569_vm1, %v567_v38, %v568_v40 }
 0x2d2   : > { %v557_v47 = vsel %vm549_vm15, %v555_v46, 0.0  ;;  %v572_v52 = vsel %vm564_vm2, %v570_v49, 0.0 }
 0x2d3   : > { %v558_v50 = vadd.f32 %v557_v47, %v530_v45 }
 0x2d5   : > { %v559_v51 = vadd.f32 %v558_v50, %v544_v48 }
 0x2d7   : > { %v573_v53 = vadd.f32 %v572_v52, %v559_v51 }
 0x2d9   : > { %v667_v54 = vmul.f32 -1.442695, %v573_v53 }
 0x2db   : > { %696 = vpow2.f32 %v667_v54 }
 0x2e8   : > { %v697_v55 = vpop.eup %696 }
 0x2e9   : > { %v577_v56 = vadd.f32 1.0, %v697_v55 }
 0x2eb   : > { %698 = vrcp.f32 %v577_v56 }
 0x2f8   : > { %v699_v61 = vpop.eup %698 }
 0x2f9   : > { %v585_v62 = vrot.slane %v699_v61, %v584_v59  ;;  %v589_v63 = vrot.slane %v699_v61, %v588_v60 }
 0x2fb   : > { %v590_v0 = vcombine.low %v585_v62, %v589_v63 }
 0x2fd   : > { %v592_v2 = vmul.f32 %v590_v0, %v761_v1 }
 0x2ff   : > { %593 = vst [vmem:[%s170_s24] sm:$0xff] %v592_v2 }
 0x300 PF: > { %s13_s12 = sadd.s32 1, %s706_s12  }
 0x301   : > { %p10_p4 = scmp.ge.s32.totalorder %s13_s12, 4  }
 0x303   :  { %12 = sbr.rel (!%p10_p4) target bundleno = 1 (0x1), region = 68 }

</bundles_post_ra>
